<compile_context>
chip_gen: v7x
topology: tpu7x:2x2x1
jax: 0.10.0
libtpu: 0.0.40
codegen_flags: <defaults>
</compile_context>

<pallas_src>
import functools

import jax
import jax.numpy as jnp
from jax import lax
from jax.experimental import pallas as pl
from jax.experimental.pallas import tpu as pltpu


def _banded_conv(src_ref, w_ref, H, K):
    """sum_dy src_ref[dy:dy+H, :] @ w_ref[dy]  with f32 accumulation."""
    acc = jnp.dot(src_ref[0:H, :], w_ref[0],
                  preferred_element_type=jnp.float32)
    for dy in range(1, K):
        acc = acc + jnp.dot(src_ref[dy:dy + H, :], w_ref[dy],
                            preferred_element_type=jnp.float32)
    return acc


def _resblock_kernel(x_ref, w1_ref, b1_ref, w2_ref, b2_ref, o_ref,
                     xpad_ref, hpad_ref, *, H, K, P, res_scale):
    """Fused conv -> ReLU -> conv -> scale -> skip-add on one (H, W*C) slab."""
    WC = x_ref.shape[-1]
    x = x_ref[0]                                   # (H, WC), native dtype

    # ---- H-halo for the input: zero only the P-row border ring --------------
    if P > 0:
        zero_ring = jnp.zeros((P, WC), xpad_ref.dtype)
        xpad_ref[:P, :] = zero_ring
        xpad_ref[P + H:H + 2 * P, :] = zero_ring
    xpad_ref[P:P + H, :] = x

    # ---- conv1 (banded matmuls) + bias + ReLU --------------------------------
    acc1 = _banded_conv(xpad_ref, w1_ref, H, K)
    h = jnp.maximum(acc1 + b1_ref[0].astype(jnp.float32), 0.0)

    # ---- H-halo for the intermediate activation ------------------------------
    if P > 0:
        zero_ring2 = jnp.zeros((P, WC), hpad_ref.dtype)
        hpad_ref[:P, :] = zero_ring2
        hpad_ref[P + H:H + 2 * P, :] = zero_ring2
    hpad_ref[P:P + H, :] = h.astype(hpad_ref.dtype)

    # ---- conv2 + bias + residual scale ---------------------------------------
    acc2 = _banded_conv(hpad_ref, w2_ref, H, K)
    res = (acc2 + b2_ref[0].astype(jnp.float32)) * res_scale

    # ---- skip-add (x already resident; no second HBM read) -------------------
    o_ref[0] = (res + x.astype(jnp.float32)).astype(o_ref.dtype)


def _banded_weight(w, W):
    """Expand (K, K, Cin, Cout) conv weights into K block-Toeplitz matrices of
    shape (W*Cin, W*Cout) so a SAME conv along W becomes a dense matmul.
    B[dy, wi*Cin+ci, wo*Cout+co] = w[dy, wi-wo+P, ci, co] (0 outside the band).
    Pure weight-layout plumbing, done once per call outside the kernel."""
    K, _, Cin, Cout = w.shape
    P = K // 2
    wi = jnp.arange(W)[:, None]                    # input column
    wo = jnp.arange(W)[None, :]                    # output column
    dx = wi - wo + P                               # tap index
    valid = (dx >= 0) & (dx < K)
    dx_c = jnp.clip(dx, 0, K - 1)
    blocks = w[:, dx_c]                            # (K, W, W, Cin, Cout)
    blocks = blocks * valid[None, :, :, None, None].astype(w.dtype)
    return jnp.transpose(blocks, (0, 1, 3, 2, 4)).reshape(K, W * Cin, W * Cout)


def resblock_pallas(x_nchw, w1, b1, w2, b2, *, res_scale=1.0):
    """x_nchw: (N, C, H, W); w: (K, K, Cin, Cout) with Cin == Cout == C; b: (C,)."""
    N, C, H, W = x_nchw.shape
    K = w1.shape[0]
    P = K // 2
    WC = W * C

    # ---- layout plumbing (plain JAX, outside the kernel) ---------------------
    # NCHW -> NHWC -> lane-dense (N, H, W*C) slabs; banded weights; tiled bias.
    x2d = jnp.transpose(x_nchw, (0, 2, 3, 1)).reshape(N, H, WC)
    w1b = _banded_weight(w1, W)                    # (K, WC, WC)
    w2b = _banded_weight(w2, W)                    # (K, WC, WC)
    b1row = jnp.tile(b1, W).reshape(1, WC)         # bias broadcast along W
    b2row = jnp.tile(b2, W).reshape(1, WC)

    kernel = functools.partial(_resblock_kernel, H=H, K=K, P=P,
                               res_scale=float(res_scale))

    # TODO(synk): for large ngf/H/W (real EDSR), add an H-row tile grid axis
    # with a P-row halo sized for v7x's 64 MiB VMEM and single-buffer the
    # constant weight blocks.
    out2d = pl.pallas_call(
        kernel,
        out_shape=jax.ShapeDtypeStruct((N, H, WC), x2d.dtype),
        grid_spec=pltpu.PrefetchScalarGridSpec(
            num_scalar_prefetch=0,
            grid=(N,),
            in_specs=[
                pl.BlockSpec((1, H, WC), lambda n: (n, 0, 0)),    # x slab
                pl.BlockSpec((K, WC, WC), lambda n: (0, 0, 0)),   # banded w1
                pl.BlockSpec((1, WC), lambda n: (0, 0)),          # bias1 row
                pl.BlockSpec((K, WC, WC), lambda n: (0, 0, 0)),   # banded w2
                pl.BlockSpec((1, WC), lambda n: (0, 0)),          # bias2 row
            ],
            out_specs=pl.BlockSpec((1, H, WC), lambda n: (n, 0, 0)),
            scratch_shapes=[
                pltpu.VMEM((H + 2 * P, WC), x2d.dtype),   # H-padded input
                pltpu.VMEM((H + 2 * P, WC), x2d.dtype),   # H-padded activation
            ],
        ),
        compiler_params=pltpu.CompilerParams(dimension_semantics=("parallel",)),
    )(x2d, w1b, b1row, w2b, b2row)

    # (N, H, W*C) -> NCHW
    return jnp.transpose(out2d.reshape(N, H, W, C), (0, 3, 1, 2))


def resblock_ref(x_nchw, w1, b1, w2, b2, *, res_scale=1.0):
    """Plain-JAX reference (NCHW, matches PyTorch semantics)."""
    def conv(x, w, b):
        xh = jnp.transpose(x, (0, 2, 3, 1))        # NHWC
        y = lax.conv_general_dilated(
            xh, w, window_strides=(1, 1), padding="SAME",
            dimension_numbers=("NHWC", "HWIO", "NHWC"))
        y = y + b.reshape(1, 1, 1, -1)
        return jnp.transpose(y, (0, 3, 1, 2))

    h = jax.nn.relu(conv(x_nchw, w1, b1))
    r = conv(h, w2, b2) * res_scale
    return r + x_nchw


if __name__ == "__main__":
    # ngf=8 channels, 16x16 spatial, kernel_size=3, batch=2, res_scale=0.1.
    N, C, H, W, K = 2, 8, 16, 16, 3
    res_scale = 0.1

    key = jax.random.PRNGKey(0)
    k_x, k_w1, k_b1, k_w2, k_b2 = jax.random.split(key, 5)

    x = jax.random.normal(k_x, (N, C, H, W), dtype=jnp.float32)
    w1 = jax.random.normal(k_w1, (K, K, C, C), dtype=jnp.float32) * 0.1
    b1 = jax.random.normal(k_b1, (C,), dtype=jnp.float32) * 0.1
    w2 = jax.random.normal(k_w2, (K, K, C, C), dtype=jnp.float32) * 0.1
    b2 = jax.random.normal(k_b2, (C,), dtype=jnp.float32) * 0.1

    out = resblock_pallas(x, w1, b1, w2, b2, res_scale=res_scale)
    out = jax.block_until_ready(out)

    ref = resblock_ref(x, w1, b1, w2, b2, res_scale=res_scale)
    assert out.shape == (N, C, H, W)
    assert jnp.allclose(out, ref, atol=1e-4, rtol=1e-4), "mismatch vs reference"

    print("KERNEL_OK")
</pallas_src>

<mosaic_0001>
module attributes {stable_mosaic.version = 11 : i64} {
  func.func @_resblock_kernel(%arg0: i32, %arg1: memref<1x16x128xf32, #tpu.memory_space<vmem>>, %arg2: memref<3x128x128xf32, #tpu.memory_space<vmem>>, %arg3: memref<1x128xf32, #tpu.memory_space<vmem>>, %arg4: memref<3x128x128xf32, #tpu.memory_space<vmem>>, %arg5: memref<1x128xf32, #tpu.memory_space<vmem>>, %arg6: memref<1x16x128xf32, #tpu.memory_space<vmem>>, %arg7: memref<18x128xf32, #tpu.memory_space<vmem>>, %arg8: memref<18x128xf32, #tpu.memory_space<vmem>>) attributes {dimension_semantics = [#tpu.dimension_semantics<parallel>], iteration_bounds = array<i64: 2>, scalar_prefetch = 0 : i64, scratch_operands = 2 : i64, tpu.core_type = #tpu.core_type<tc>, window_params = [{transform_indices = @transform_0, window_bounds = array<i64: 1, 16, 128>}, {pipeline_mode = #tpu.pipeline_mode<synchronous>, transform_indices = @transform_1, window_bounds = array<i64: 3, 128, 128>}, {pipeline_mode = #tpu.pipeline_mode<synchronous>, transform_indices = @transform_2, window_bounds = array<i64: 1, 128>}, {pipeline_mode = #tpu.pipeline_mode<synchronous>, transform_indices = @transform_3, window_bounds = array<i64: 3, 128, 128>}, {pipeline_mode = #tpu.pipeline_mode<synchronous>, transform_indices = @transform_4, window_bounds = array<i64: 1, 128>}, {transform_indices = @transform_5, window_bounds = array<i64: 1, 16, 128>}]} {
    %c0 = arith.constant 0 : index
    %c0_0 = arith.constant 0 : index
    %c0_1 = arith.constant 0 : index
    %0 = vector.load %arg1[%c0, %c0_0, %c0_1] : memref<1x16x128xf32, #tpu.memory_space<vmem>>, vector<1x16x128xf32>
    %1 = vector.shape_cast %0 : vector<1x16x128xf32> to vector<16x128xf32>
    %cst = arith.constant 0.000000e+00 : f32
    %2 = vector.broadcast %cst : f32 to vector<1x128xf32>
    %c0_2 = arith.constant 0 : index
    %c0_3 = arith.constant 0 : index
    %3 = vector.load %arg7[%c0_2, %c0_3] : memref<18x128xf32, #tpu.memory_space<vmem>>, vector<1x128xf32>
    tpu.vector_store %arg7[%c0_2, %c0_3], %2 {strides = array<i32>} : memref<18x128xf32, #tpu.memory_space<vmem>>, vector<1x128xf32>,
    %c17 = arith.constant 17 : index
    %c0_4 = arith.constant 0 : index
    %4 = vector.load %arg7[%c17, %c0_4] : memref<18x128xf32, #tpu.memory_space<vmem>>, vector<1x128xf32>
    tpu.vector_store %arg7[%c17, %c0_4], %2 {strides = array<i32>} : memref<18x128xf32, #tpu.memory_space<vmem>>, vector<1x128xf32>,
    %c1 = arith.constant 1 : index
    %c0_5 = arith.constant 0 : index
    %5 = vector.load %arg7[%c1, %c0_5] : memref<18x128xf32, #tpu.memory_space<vmem>>, vector<16x128xf32>
    tpu.vector_store %arg7[%c1, %c0_5], %1 {strides = array<i32>} : memref<18x128xf32, #tpu.memory_space<vmem>>, vector<16x128xf32>,
    %c0_6 = arith.constant 0 : index
    %c0_7 = arith.constant 0 : index
    %6 = vector.load %arg7[%c0_6, %c0_7] : memref<18x128xf32, #tpu.memory_space<vmem>>, vector<16x128xf32>
    %c0_8 = arith.constant 0 : index
    %c0_9 = arith.constant 0 : index
    %c0_10 = arith.constant 0 : index
    %7 = vector.load %arg2[%c0_8, %c0_9, %c0_10] : memref<3x128x128xf32, #tpu.memory_space<vmem>>, vector<1x128x128xf32>
    %8 = vector.shape_cast %7 : vector<1x128x128xf32> to vector<128x128xf32>
    %cst_11 = arith.constant dense<0.000000e+00> : vector<16x128xf32>
    %9 = tpu.matmul %6, %8, %cst_11 {dimension_numbers = #tpu.dot_dimension_numbers<[1], [0], [0], [1], [0, 0, 1, 1], [], []>} : vector<16x128xf32>, vector<128x128xf32>, vector<16x128xf32> -> vector<16x128xf32>
    %c1_12 = arith.constant 1 : index
    %c0_13 = arith.constant 0 : index
    %10 = vector.load %arg7[%c1_12, %c0_13] : memref<18x128xf32, #tpu.memory_space<vmem>>, vector<16x128xf32>
    %c1_14 = arith.constant 1 : index
    %c0_15 = arith.constant 0 : index
    %c0_16 = arith.constant 0 : index
    %11 = vector.load %arg2[%c1_14, %c0_15, %c0_16] : memref<3x128x128xf32, #tpu.memory_space<vmem>>, vector<1x128x128xf32>
    %12 = vector.shape_cast %11 : vector<1x128x128xf32> to vector<128x128xf32>
    %cst_17 = arith.constant dense<0.000000e+00> : vector<16x128xf32>
    %13 = tpu.matmul %10, %12, %cst_17 {dimension_numbers = #tpu.dot_dimension_numbers<[1], [0], [0], [1], [0, 0, 1, 1], [], []>} : vector<16x128xf32>, vector<128x128xf32>, vector<16x128xf32> -> vector<16x128xf32>
    %14 = arith.addf %9, %13 : vector<16x128xf32>
    %c2 = arith.constant 2 : index
    %c0_18 = arith.constant 0 : index
    %15 = vector.load %arg7[%c2, %c0_18] : memref<18x128xf32, #tpu.memory_space<vmem>>, vector<16x128xf32>
    %c2_19 = arith.constant 2 : index
    %c0_20 = arith.constant 0 : index
    %c0_21 = arith.constant 0 : index
    %16 = vector.load %arg2[%c2_19, %c0_20, %c0_21] : memref<3x128x128xf32, #tpu.memory_space<vmem>>, vector<1x128x128xf32>
    %17 = vector.shape_cast %16 : vector<1x128x128xf32> to vector<128x128xf32>
    %cst_22 = arith.constant dense<0.000000e+00> : vector<16x128xf32>
    %18 = tpu.matmul %15, %17, %cst_22 {dimension_numbers = #tpu.dot_dimension_numbers<[1], [0], [0], [1], [0, 0, 1, 1], [], []>} : vector<16x128xf32>, vector<128x128xf32>, vector<16x128xf32> -> vector<16x128xf32>
    %19 = arith.addf %14, %18 : vector<16x128xf32>
    %c0_23 = arith.constant 0 : index
    %c0_24 = arith.constant 0 : index
    %20 = vector.load %arg3[%c0_23, %c0_24] : memref<1x128xf32, #tpu.memory_space<vmem>>, vector<1x128xf32>
    %21 = vector.shape_cast %20 : vector<1x128xf32> to vector<128xf32>
    %22 = vector.shape_cast %21 : vector<128xf32> to vector<1x128xf32>
    %23 = vector.broadcast %22 : vector<1x128xf32> to vector<16x128xf32>
    %24 = arith.addf %19, %23 : vector<16x128xf32>
    %cst_25 = arith.constant 0.000000e+00 : f32
    %25 = vector.broadcast %cst_25 : f32 to vector<16x128xf32>
    %26 = arith.maximumf %24, %25 : vector<16x128xf32>
    %cst_26 = arith.constant 0.000000e+00 : f32
    %27 = vector.broadcast %cst_26 : f32 to vector<1x128xf32>
    %c0_27 = arith.constant 0 : index
    %c0_28 = arith.constant 0 : index
    %28 = vector.load %arg8[%c0_27, %c0_28] : memref<18x128xf32, #tpu.memory_space<vmem>>, vector<1x128xf32>
    tpu.vector_store %arg8[%c0_27, %c0_28], %27 {strides = array<i32>} : memref<18x128xf32, #tpu.memory_space<vmem>>, vector<1x128xf32>,
    %c17_29 = arith.constant 17 : index
    %c0_30 = arith.constant 0 : index
    %29 = vector.load %arg8[%c17_29, %c0_30] : memref<18x128xf32, #tpu.memory_space<vmem>>, vector<1x128xf32>
    tpu.vector_store %arg8[%c17_29, %c0_30], %27 {strides = array<i32>} : memref<18x128xf32, #tpu.memory_space<vmem>>, vector<1x128xf32>,
    %c1_31 = arith.constant 1 : index
    %c0_32 = arith.constant 0 : index
    %30 = vector.load %arg8[%c1_31, %c0_32] : memref<18x128xf32, #tpu.memory_space<vmem>>, vector<16x128xf32>
    tpu.vector_store %arg8[%c1_31, %c0_32], %26 {strides = array<i32>} : memref<18x128xf32, #tpu.memory_space<vmem>>, vector<16x128xf32>,
    %c0_33 = arith.constant 0 : index
    %c0_34 = arith.constant 0 : index
    %31 = vector.load %arg8[%c0_33, %c0_34] : memref<18x128xf32, #tpu.memory_space<vmem>>, vector<16x128xf32>
    %c0_35 = arith.constant 0 : index
    %c0_36 = arith.constant 0 : index
    %c0_37 = arith.constant 0 : index
    %32 = vector.load %arg4[%c0_35, %c0_36, %c0_37] : memref<3x128x128xf32, #tpu.memory_space<vmem>>, vector<1x128x128xf32>
    %33 = vector.shape_cast %32 : vector<1x128x128xf32> to vector<128x128xf32>
    %cst_38 = arith.constant dense<0.000000e+00> : vector<16x128xf32>
    %34 = tpu.matmul %31, %33, %cst_38 {dimension_numbers = #tpu.dot_dimension_numbers<[1], [0], [0], [1], [0, 0, 1, 1], [], []>} : vector<16x128xf32>, vector<128x128xf32>, vector<16x128xf32> -> vector<16x128xf32>
    %c1_39 = arith.constant 1 : index
    %c0_40 = arith.constant 0 : index
    %35 = vector.load %arg8[%c1_39, %c0_40] : memref<18x128xf32, #tpu.memory_space<vmem>>, vector<16x128xf32>
    %c1_41 = arith.constant 1 : index
    %c0_42 = arith.constant 0 : index
    %c0_43 = arith.constant 0 : index
    %36 = vector.load %arg4[%c1_41, %c0_42, %c0_43] : memref<3x128x128xf32, #tpu.memory_space<vmem>>, vector<1x128x128xf32>
    %37 = vector.shape_cast %36 : vector<1x128x128xf32> to vector<128x128xf32>
    %cst_44 = arith.constant dense<0.000000e+00> : vector<16x128xf32>
    %38 = tpu.matmul %35, %37, %cst_44 {dimension_numbers = #tpu.dot_dimension_numbers<[1], [0], [0], [1], [0, 0, 1, 1], [], []>} : vector<16x128xf32>, vector<128x128xf32>, vector<16x128xf32> -> vector<16x128xf32>
    %39 = arith.addf %34, %38 : vector<16x128xf32>
    %c2_45 = arith.constant 2 : index
    %c0_46 = arith.constant 0 : index
    %40 = vector.load %arg8[%c2_45, %c0_46] : memref<18x128xf32, #tpu.memory_space<vmem>>, vector<16x128xf32>
    %c2_47 = arith.constant 2 : index
    %c0_48 = arith.constant 0 : index
    %c0_49 = arith.constant 0 : index
    %41 = vector.load %arg4[%c2_47, %c0_48, %c0_49] : memref<3x128x128xf32, #tpu.memory_space<vmem>>, vector<1x128x128xf32>
    %42 = vector.shape_cast %41 : vector<1x128x128xf32> to vector<128x128xf32>
    %cst_50 = arith.constant dense<0.000000e+00> : vector<16x128xf32>
    %43 = tpu.matmul %40, %42, %cst_50 {dimension_numbers = #tpu.dot_dimension_numbers<[1], [0], [0], [1], [0, 0, 1, 1], [], []>} : vector<16x128xf32>, vector<128x128xf32>, vector<16x128xf32> -> vector<16x128xf32>
    %44 = arith.addf %39, %43 : vector<16x128xf32>
    %c0_51 = arith.constant 0 : index
    %c0_52 = arith.constant 0 : index
    %45 = vector.load %arg5[%c0_51, %c0_52] : memref<1x128xf32, #tpu.memory_space<vmem>>, vector<1x128xf32>
    %46 = vector.shape_cast %45 : vector<1x128xf32> to vector<128xf32>
    %47 = vector.shape_cast %46 : vector<128xf32> to vector<1x128xf32>
    %48 = vector.broadcast %47 : vector<1x128xf32> to vector<16x128xf32>
    %49 = arith.addf %44, %48 : vector<16x128xf32>
    %cst_53 = arith.constant 1.000000e-01 : f32
    %50 = vector.broadcast %cst_53 : f32 to vector<16x128xf32>
    %51 = arith.mulf %49, %50 : vector<16x128xf32>
    %52 = arith.addf %51, %1 : vector<16x128xf32>
    %c0_54 = arith.constant 0 : index
    %c0_55 = arith.constant 0 : index
    %c0_56 = arith.constant 0 : index
    %53 = vector.load %arg6[%c0_54, %c0_55, %c0_56] : memref<1x16x128xf32, #tpu.memory_space<vmem>>, vector<1x16x128xf32>
    %54 = vector.shape_cast %53 : vector<1x16x128xf32> to vector<16x128xf32>
    %55 = vector.shape_cast %52 : vector<16x128xf32> to vector<1x16x128xf32>
    tpu.vector_store %arg6[%c0_54, %c0_55, %c0_56], %55 {strides = array<i32>} : memref<1x16x128xf32, #tpu.memory_space<vmem>>, vector<1x16x128xf32>,
    return
  }
  func.func @transform_0(%arg0: i32) -> (i32, i32, i32) {
    %c0_i32 = arith.constant 0 : i32
    %c0_i32_0 = arith.constant 0 : i32
    %c0_i32_1 = arith.constant 0 : i32
    return %arg0, %c0_i32, %c0_i32_0 : i32, i32, i32
  }
  func.func @transform_1(%arg0: i32) -> (i32, i32, i32) {
    %c0_i32 = arith.constant 0 : i32
    %c0_i32_0 = arith.constant 0 : i32
    %c0_i32_1 = arith.constant 0 : i32
    %c0_i32_2 = arith.constant 0 : i32
    return %c0_i32, %c0_i32_0, %c0_i32_1 : i32, i32, i32
  }
  func.func @transform_2(%arg0: i32) -> (i32, i32) {
    %c0_i32 = arith.constant 0 : i32
    %c0_i32_0 = arith.constant 0 : i32
    %c0_i32_1 = arith.constant 0 : i32
    return %c0_i32, %c0_i32_0 : i32, i32
  }
  func.func @transform_3(%arg0: i32) -> (i32, i32, i32) {
    %c0_i32 = arith.constant 0 : i32
    %c0_i32_0 = arith.constant 0 : i32
    %c0_i32_1 = arith.constant 0 : i32
    %c0_i32_2 = arith.constant 0 : i32
    return %c0_i32, %c0_i32_0, %c0_i32_1 : i32, i32, i32
  }
  func.func @transform_4(%arg0: i32) -> (i32, i32) {
    %c0_i32 = arith.constant 0 : i32
    %c0_i32_0 = arith.constant 0 : i32
    %c0_i32_1 = arith.constant 0 : i32
    return %c0_i32, %c0_i32_0 : i32, i32
  }
  func.func @transform_5(%arg0: i32) -> (i32, i32, i32) {
    %c0_i32 = arith.constant 0 : i32
    %c0_i32_0 = arith.constant 0 : i32
    %c0_i32_1 = arith.constant 0 : i32
    return %arg0, %c0_i32, %c0_i32_0 : i32, i32, i32
  }
}

</mosaic_0001>

<bundles_post_ra>
// kernel: tpu_custom_call.1
= control target key start
LH: loop header
LB: loop body
LE: loop exit
PB: predicated region body
PF: predicated region fallthrough
CT: control target
= control target key end

     0   :  { %10 = vsyncpa [#allocation5], 0  ;;  %s2052_s0 = inlined_call_operand.hbm [shape: f32[2,16,128], index: 0, kind: input, shape index: {}]   ;;  %s2053_s1 = inlined_call_operand.hbm [shape: f32[3,128,128], index: 1, kind: input, shape index: {}]   ;;  %s2054_s2 = inlined_call_operand.vmem [shape: f32[1,128], index: 2, kind: input, shape index: {}]   ;;  %s2055_s3 = inlined_call_operand.hbm [shape: f32[3,128,128], index: 3, kind: input, shape index: {}]   ;;  %s2056_s4 = inlined_call_operand.vmem [shape: f32[1,128], index: 4, kind: input, shape index: {}]   ;;  %s2057_s5 = inlined_call_operand.hbm [shape: f32[2,16,128], index: 5, kind: output, shape index: {}]  }
   0x1   :  { %12 = vsyncpa [#allocation5 + $0x1], 0 }
   0x2   :  { %13 = vsyncpa [#allocation8], 0 }
   0x3   :  { %14 = vsyncpa [#allocation6], 0 }
   0x4   :  { %16 = vsyncpa [#allocation6 + $0x1], 0  ;;  %s1789_s18 = smov 0   ;;  %s1791_s19 = smov 0  }
   0x5   :  { %s1793_s20 = smov 0   ;;  %s1795_s21 = smov 0  }
   0x6 LB: > { %s1810_s22 = sadd.s32 4294967295, %s1748_s21   ;;  %s980_s23 = sadd.s32 4294967294, %s1748_s21   ;;  %s1748_s21 = sphi %s1795_s21, %s2077_s21   ;;  %s1744_s20 = sphi %s1793_s20, %s2076_s20   ;;  %s1740_s19 = sphi %s1791_s19, %s2075_s19   ;;  %s1736_s18 = sphi %s1789_s18, %s2074_s18  }
   0x7   : > { %p42_p0 = scmp.ne.s32.totalorder %s1740_s19, %s1736_s18  ;;  %p2058_p1 = scmp.eq.s32.totalorder %s1810_s22, 0 }
   0x8   : > { %p156_p3 = scmp.eq.s32.totalorder %s980_s23, 1  ;;  %p981_p5 = scmp.ge.s32.totalorder %s1748_s21, 1 }
   0x9   : > { %p1819_p4 = por %p2058_p1, %p42_p0  ;;  %p163_p7 = scmp.lt.s32.totalorder %s1748_s21, 3 }
   0xa   : > { %p1824_p6 = por %p156_p3, %p42_p0  ;;  %s1750_s27 = smov [#allocation7]  }
   0xb   : > { %s2061_s24 = scalar_select %p1819_p4, 1, 0 }
   0xc   : > { %s2062_s25 = scalar_select %p1824_p6, 1, 0 }
   0xd   : > { %p1829_p8 = pnand %p981_p5, %p163_p7  ;;  %s175_s28 = sshll.u32 %s1750_s27, 4  ;;  %s1833_s28 = int_to_ptr.vmem [resolvable:$true] %s175_s28 }
   0xe   : > { %s1751_s30 = smov [#allocation9]   ;;  %s1592_s9 = scalar_lea.hbm %s2053_s1, 6144 }
   0xf   : > { %p1532_p9 = pneg %p1829_p8  ;;  %s191_s6 = sshll.u32 %s1751_s30, 4  ;;  %s1844_s6 = int_to_ptr.vmem [resolvable:$true] %s191_s6 }
  0x10   : > { %p1593_p12 = scmp.ne.s32.totalorder %s2053_s1, %s1592_s9  ;;  %p1599_p5 = scmp.lt.u32.totalorder %s1592_s9, %s2053_s1 }
  0x11   : > { %p1840_p11 = pnand %p1532_p9, %p2058_p1 }
  0x13   : > { %p1594_p13 = pneg %p1840_p11 }
  0x15   : > { %p1595_p0 = pnand %p1594_p13, %p1593_p12 }
  0x17   : > { %p1596_p3 = pneg %p1595_p0 }
  0x19   : > { %p1601_p7 = pnand %p1599_p5, %p1596_p3 }
  0x1b   : > { %1604 = shalt.err (!%p1601_p7)
}
  0x1c   : > { %s1605_s14 = scalar_lea.vmem %s1833_s28, 6144  ;;  %p1613_p2 = scmp.lt.s32.totalorder %s1833_s28, %s1833_s28 }
  0x1d   : > { %p1606_p9 = scmp.ne.s32.totalorder %s1833_s28, %s1605_s14  ;;  %p1614_p12 = scmp.lt.s32.totalorder %s1605_s14, %s1605_s14 }
  0x1f   : > { %p1608_p10 = pnand %p1606_p9, %p1594_p13  ;;  %p1615_p0 = por %p1614_p12, %p1613_p2 }
  0x21   : > { %p1609_p1 = pneg %p1608_p10 }
  0x23   : > { %p1616_p6 = pnand %p1615_p0, %p1609_p1 }
  0x25   : > { %1619 = shalt.err (!%p1616_p6)
}
  0x26   : > { %s1752_s15 = smov 128   ;;  %s1753_s16 = smov 8  }
  0x27   : > { %1535 = dma.hbm_to_vmem [thread:$0]  (!%p1840_p11), %s2053_s1, 6144, %s1833_s28, [#allocation8], %s1752_s15, %s1752_s15, %s1753_s16  }
  0x28   : > { %s1620_s7 = scalar_lea.hbm %s2055_s3, 6144 }
  0x29   : > { %p1621_p1 = scmp.ne.s32.totalorder %s2055_s3, %s1620_s7  ;;  %p1627_p10 = scmp.lt.u32.totalorder %s1620_s7, %s2055_s3 }
  0x2b   : > { %p1623_p2 = pnand %p1621_p1, %p1594_p13 }
  0x2d   : > { %p1624_p6 = pneg %p1623_p2 }
  0x2f   : > { %p1629_p3 = pnand %p1627_p10, %p1624_p6 }
  0x31   : > { %1632 = shalt.err (!%p1629_p3)
}
  0x32   : > { %s1633_s28 = scalar_lea.vmem %s1844_s6, 6144  ;;  %p1641_p12 = scmp.lt.s32.totalorder %s1844_s6, %s1844_s6 }
  0x33   : > { %p1634_p5 = scmp.ne.s32.totalorder %s1844_s6, %s1633_s28  ;;  %p1642_p0 = scmp.lt.s32.totalorder %s1633_s28, %s1633_s28 }
  0x35   : > { %p1636_p7 = pnand %p1634_p5, %p1594_p13  ;;  %p1643_p1 = por %p1642_p0, %p1641_p12 }
  0x37   : > { %p1637_p9 = pneg %p1636_p7 }
  0x39   : > { %p1644_p2 = pnand %p1643_p1, %p1637_p9 }
  0x3b   : > { %1647 = shalt.err (!%p1644_p2)
}
  0x3c   : > { %1538 = dma.hbm_to_vmem [thread:$0]  (!%p1840_p11), %s2055_s3, 6144, %s1844_s6, [#allocation8], %s1752_s15, %s1752_s15, %s1753_s16  }
  0x3d   : > { %s1905_s29 = sadd.s32 1, %s1748_s21   ;;  %s29_s14 = sadd.s32 1, %s1744_s20 }
  0x3e   : > { %s26_s17 = ssub.s32 %s1748_s21, %s1905_s29  ;;  %p36_p13 = scmp.ne.s32.totalorder %s1744_s20, %s1740_s19 }
  0x3f   : > { %p27_p6 = scmp.eq.s32.totalorder %s26_s17, 0  ;;  %p37_p10 = scmp.eq.s32.totalorder %s1748_s21, 0 }
  0x40   : > { %p2065_p3 = scmp.eq.s32.totalorder %s1810_s22, 1  ;;  %p1549_p7 = scmp.lt.s32.totalorder %s1748_s21, 2 }
  0x41   : > { %s1921_s27 = scalar_select %p27_p6, %s1744_s20, %s29_s14  }
  0x42   : > { %p1915_p5 = por %p2065_p3, %p36_p13  ;;  %p38_p9 = por %p37_p10, %p36_p13 }
  0x43   : > { %s208_s30 = sand.u32 1, %s1744_s20   ;;  %s1000_s6 = sshll.u32 %s1748_s21, 8 }
  0x44   : > { %s2066_s23 = scalar_select %p1915_p5, 1, 0 }
  0x45   : > { %s985_s7 = sshll.u32 %s208_s30, 4  ;;  %s1928_s10 = scalar_lea.hbm %s2052_s0, %s1000_s6 }
  0x46   : > { %s212_s11 = scalar_lea.vmem [#allocation4], %s985_s7  ;;  %p1932_p11 = pnand %p1549_p7, %p38_p9 }
  0x47   : > { %s219_s28 = sshll.u32 %s212_s11, 4  ;;  %s1936_s13 = scalar_lea.sflag [#allocation5], %s208_s30  ;;  %s1930_s28 = int_to_ptr.vmem [resolvable:$true] %s219_s28 }
  0x48   : > { %s1648_s14 = scalar_lea.hbm %s1928_s10, 256  ;;  %p1650_p0 = pneg %p1932_p11 }
  0x49   : > { %p1649_p12 = scmp.ne.s32.totalorder %s1928_s10, %s1648_s14  ;;  %s1653_s6 = scalar_lea.hbm %s2052_s0, 512 }
  0x4a   : > { %p1654_p13 = scmp.lt.u32.totalorder %s1928_s10, %s2052_s0  ;;  %p1655_p6 = scmp.lt.u32.totalorder %s1653_s6, %s1648_s14 }
  0x4b   : > { %p1651_p1 = pnand %p1650_p0, %p1649_p12  ;;  %p1657_p3 = scmp.lt.u32.totalorder %s1648_s14, %s1928_s10 }
  0x4c   : > { %p1656_p10 = por %p1655_p6, %p1654_p13 }
  0x4d   : > { %p1652_p2 = pneg %p1651_p1 }
  0x4e   : > { %p1658_p7 = por %p1657_p3, %p1656_p10 }
  0x50   : > { %p1659_p9 = pnand %p1658_p7, %p1652_p2 }
  0x52   : > { %1662 = shalt.err (!%p1659_p9)
}
  0x53   : > { %s1663_s30 = scalar_lea.vmem %s1930_s28, 256  ;;  %s1754_s11 = smov [#allocation4]  }
  0x54   : > { %p1664_p12 = scmp.ne.s32.totalorder %s1930_s28, %s1663_s30  ;;  %s1668_s17 = sshll.u32 %s1754_s11, 4  ;;  %s1669_s17 = int_to_ptr.vmem [resolvable:$false] %s1668_s17 }
  0x55   : > { %s1670_s7 = scalar_lea.vmem %s1669_s17, 512  ;;  %p1671_p4 = scmp.lt.s32.totalorder %s1930_s28, %s1669_s17 }
  0x56   : > { %p1666_p1 = pnand %p1664_p12, %p1650_p0  ;;  %p1672_p13 = scmp.lt.s32.totalorder %s1670_s7, %s1663_s30 }
  0x58   : > { %p1667_p5 = pneg %p1666_p1  ;;  %p1673_p6 = por %p1672_p13, %p1671_p4 }
  0x5a   : > { %p1674_p10 = pnand %p1673_p6, %p1667_p5 }
  0x5c   : > { %1677 = shalt.err (!%p1674_p10)
}
  0x5d   : > { %1542 = dma.hbm_to_vmem [thread:$0]  (!%p1932_p11), %s1928_s10, 256, %s1930_s28, %s1936_s13, %s1752_s15, %s1752_s15, %s1753_s16  }
  0x5e   : > { %231 = sbr.rel (%p1829_p8) target bundleno = 720 (0x2d0), region = 40  ;;  %s1970_s14 = sand.u32 (!%p1829_p8), 1, %s1740_s19  }
  0x5f   : > { %s989_s6 = sshll.u32 (!%p1829_p8), %s1970_s14, 4  ;;  %s234_s8 = scalar_lea.sflag (!%p1829_p8), [#allocation5], %s1970_s14 }
  0x60   : > { %s237_s12 = scalar_lea.vmem (!%p1829_p8), [#allocation4], %s989_s6  ;;  %p2068_p4 = scmp.ne.s32.totalorder (!%p1829_p8), %s2061_s24, 0 }
  0x65   : > { %1723 = dma.done.wait (%p2068_p4), %s234_s8, 256  }
  0x66   : > { %1725 = vsyncadd (%p2068_p4), %s234_s8, 4294967040  ;;  %p2069_p5 = scmp.eq.s32.totalorder %s1810_s22, 0 }
  0x68   : > { %1727 = dma.done.wait (%p2069_p5), [#allocation8], 12288   ;;  %p2070_p8 = pmov %p2069_p5 }
  0x69   : > { %v1755_v0 = vmov 0.0   ;;  %v299_v1 = vld [vmem:[#allocation7 + $0x80] sm:$0xff]  ;;  %v300_v2 = vld [vmem:[#allocation7 + $0x88] sm:$0xff]  ;;  %v301_v3 = vld [vmem:[#allocation7 + $0x90] sm:$0xff]  ;;  %s271_s10 = scalar_lea.vmem [#allocation10], %s989_s6  ;;  %s1001_s13 = sshll.u32 %s1810_s22, 8 }
  0x6a   : > { %1729 = vsyncadd (%p2070_p8), [#allocation8], 4294955008  ;;  %274 = vst [vmem:[#allocation2] sm:$0x1] %v1755_v0  ;;  %v1320_v4 = vpack.c.bf16 %v300_v2, %v299_v1  ;;  %v302_v5 = vld [vmem:[#allocation7 + $0x98] sm:$0xff]  ;;  %v303_v7 = vld [vmem:[#allocation7 + $0xa0] sm:$0xff]  ;;  %s2007_s11 = scalar_lea.hbm %s2057_s5, %s1001_s13 }
  0x6b   : > { %275 = vst [vmem:[#allocation2 + $0x11] sm:$0x1] %v1755_v0  ;;  %572 = vst [vmem:[#allocation3] sm:$0x1] %v1755_v0  ;;  %v1324_v6 = vpack.c.bf16 %v302_v5, %v301_v3  ;;  %v304_v8 = vld [vmem:[#allocation7 + $0xa8] sm:$0xff]  ;;  %v1984_v10 = vld [vmem:[%s237_s12] sm:$0xff] }
  0x6c   : > { %573 = vst [vmem:[#allocation3 + $0x11] sm:$0x1] %v1755_v0  ;;  %1321 = vmatprep.subr.bf16.mxu0 %v1320_v4  ;;  %v1328_v9 = vpack.c.bf16 %v304_v8, %v303_v7  ;;  %v305_v11 = vld [vmem:[#allocation7 + $0xb0] sm:$0xff]  ;;  %v306_v12 = vld [vmem:[#allocation7 + $0xb8] sm:$0xff]  ;;  %276 = vst [vmem:[#allocation2 + $0x1] sm:$0xff] %v1984_v10  ;;  %1142 = vmatprep.mubr.f32.mxu0 %v1984_v10  ;;  %s888_s28 = sshll.u32 %s271_s10, 4  ;;  %s2001_s28 = int_to_ptr.vmem [resolvable:$true] %s888_s28 }
  0x6d   : > { %1323 = vmatpush3.bf16.msra.mxu0 %v1320_v4  ;;  %v1988_v13 = vld [vmem:[%s237_s12 + $0x8] sm:$0xff]  ;;  %v1332_v14 = vpack.c.bf16 %v306_v12, %v305_v11  ;;  %v307_v15 = vld [vmem:[#allocation7 + $0xc0] sm:$0xff]  ;;  %v309_v18 = vld [vmem:[#allocation7 + $0xd0] sm:$0xff]  ;;  %s875_s17 = scalar_lea.sflag [#allocation6], %s1970_s14  ;;  %s1678_s22 = scalar_lea.vmem %s2001_s28, 256 }
  0x6e   : > { %1325 = vmatprep.subr.bf16.mxu0 %v1324_v6  ;;  %277 = vst [vmem:[#allocation2 + $0x9] sm:$0xff] %v1988_v13  ;;  %v308_v16 = vld [vmem:[#allocation7 + $0xc8] sm:$0xff]  ;;  %v310_v19 = vld [vmem:[#allocation7 + $0xd8] sm:$0xff]  ;;  %v311_v21 = vld [vmem:[#allocation7 + $0xe0] sm:$0xff]  ;;  %p1679_p11 = scmp.ne.s32.totalorder %s2001_s28, %s1678_s22  ;;  %p2071_p0 = scmp.ne.s32.totalorder %s2066_s23, 0 }
  0x6f   : > { %v1336_v17 = vpack.c.bf16 %v308_v16, %v307_v15  ;;  %v1340_v20 = vpack.c.bf16 %v310_v19, %v309_v18  ;;  %v312_v22 = vld [vmem:[#allocation7 + $0xe8] sm:$0xff]  ;;  %v597_v23 = vld [vmem:[#allocation9 + $0x80] sm:$0xff]  ;;  %v599_v25 = vld [vmem:[#allocation9 + $0x90] sm:$0xff]  ;;  %s1756_s7 = smov [#allocation10]  }
  0x70   : > { %v598_v24 = vld [vmem:[#allocation9 + $0x88] sm:$0xff]  ;;  %v600_v27 = vld [vmem:[#allocation9 + $0x98] sm:$0xff]  ;;  %v601_v29 = vld [vmem:[#allocation9 + $0xa0] sm:$0xff]  ;;  %v1344_v31 = vpack.c.bf16 %v312_v22, %v311_v21  ;;  %p1680_p2 = pnand %p1679_p11, %p2071_p0  ;;  %s1682_s6 = sshll.u32 %s1756_s7, 4  ;;  %s1683_s6 = int_to_ptr.vmem [resolvable:$false] %s1682_s6 }
  0x71   : > { %1327 = vmatpush3.bf16.msra.mxu0 %v1324_v6  ;;  %v1416_v26 = vpack.c.bf16 %v598_v24, %v597_v23  ;;  %v1420_v28 = vpack.c.bf16 %v600_v27, %v599_v25  ;;  %v602_v30 = vld [vmem:[#allocation9 + $0xa8] sm:$0xff]  ;;  %v313_v32 = vld [vmem:[#allocation7 + $0xf0] sm:$0xff]  ;;  %v314_v33 = vld [vmem:[#allocation7 + $0xf8] sm:$0xff]  ;;  %s1684_s8 = scalar_lea.vmem %s1683_s6, 512  ;;  %p1685_p7 = scmp.lt.s32.totalorder %s2001_s28, %s1683_s6 }
  0x72   : > { %1329 = vmatprep.subr.bf16.mxu0 %v1328_v9  ;;  %v1424_v34 = vpack.c.bf16 %v602_v30, %v601_v29  ;;  %v603_v35 = vld [vmem:[#allocation9 + $0xb0] sm:$0xff]  ;;  %v604_v36 = vld [vmem:[#allocation9 + $0xb8] sm:$0xff]  ;;  %v1348_v37 = vpack.c.bf16 %v314_v33, %v313_v32  ;;  %v280_v38 = vld [vmem:[#allocation7] sm:$0xff]  ;;  %p1681_p3 = pneg %p1680_p2  ;;  %p1686_p9 = scmp.lt.s32.totalorder %s1684_s8, %s1678_s22 }
  0x73   : > { %1417 = vmatprep.subr.bf16.mxu1 %v1416_v26  ;;  %v281_v39 = vld [vmem:[#allocation7 + $0x8] sm:$0xff]  ;;  %v1428_v40 = vpack.c.bf16 %v604_v36, %v603_v35  ;;  %v605_v41 = vld [vmem:[#allocation9 + $0xc0] sm:$0xff]  ;;  %v282_v44 = vld [vmem:[#allocation7 + $0x10] sm:$0xff] }
  0x74   : > { %1419 = vmatpush3.bf16.msra.mxu1 %v1416_v26  ;;  %v606_v42 = vld [vmem:[#allocation9 + $0xc8] sm:$0xff]  ;;  %v1352_v43 = vpack.c.bf16 %v281_v39, %v280_v38  ;;  %v283_v45 = vld [vmem:[#allocation7 + $0x18] sm:$0xff]  ;;  %v278_v48 = vld [vmem:[#allocation2] sm:$0xff]  ;;  %p1687_p12 = por %p1686_p9, %p1685_p7 }
  0x75   : > { %1331 = vmatpush3.bf16.msra.mxu0 %v1328_v9  ;;  %1421 = vmatprep.subr.bf16.mxu1 %v1420_v28  ;;  %v1432_v46 = vpack.c.bf16 %v606_v42, %v605_v41  ;;  %v1356_v47 = vpack.c.bf16 %v283_v45, %v282_v44  ;;  %v284_v49 = vld [vmem:[#allocation7 + $0x20] sm:$0xff]  ;;  %v285_v50 = vld [vmem:[#allocation7 + $0x28] sm:$0xff]  ;;  %v286_v52 = vld [vmem:[#allocation7 + $0x30] sm:$0xff] }
  0x76   : > { %1333 = vmatprep.subr.bf16.mxu0 %v1332_v14  ;;  %v1360_v51 = vpack.c.bf16 %v285_v50, %v284_v49  ;;  %v287_v53 = vld [vmem:[#allocation7 + $0x38] sm:$0xff]  ;;  %v288_v55 = vld [vmem:[#allocation7 + $0x40] sm:$0xff]  ;;  %v289_v56 = vld [vmem:[#allocation7 + $0x48] sm:$0xff]  ;;  %p1688_p1 = pnand %p1687_p12, %p1681_p3 }
  0x77   : > { %v1364_v54 = vpack.c.bf16 %v287_v53, %v286_v52  ;;  %v1368_v57 = vpack.c.bf16 %v289_v56, %v288_v55  ;;  %v290_v58 = vld [vmem:[#allocation7 + $0x50] sm:$0xff]  ;;  %v291_v59 = vld [vmem:[#allocation7 + $0x58] sm:$0xff]  ;;  %v292_v61 = vld [vmem:[#allocation7 + $0x60] sm:$0xff] }
  0x78   : > { %1423 = vmatpush3.bf16.msra.mxu1 %v1420_v28  ;;  %v1372_v60 = vpack.c.bf16 %v291_v59, %v290_v58  ;;  %v293_v62 = vld [vmem:[#allocation7 + $0x68] sm:$0xff]  ;;  %v294_v0 = vld [vmem:[#allocation7 + $0x70] sm:$0xff]  ;;  %v295_v1 = vld [vmem:[#allocation7 + $0x78] sm:$0xff] }
  0x79   : > { %1335 = vmatpush3.bf16.msra.mxu0 %v1332_v14  ;;  %1425 = vmatprep.subr.bf16.mxu1 %v1424_v34  ;;  %v1376_v63 = vpack.c.bf16 %v293_v62, %v292_v61  ;;  %v1380_v2 = vpack.c.bf16 %v295_v1, %v294_v0  ;;  %v468_v3 = vld [vmem:[#allocation7 + $0x100] sm:$0xff]  ;;  %v469_v4 = vld [vmem:[#allocation7 + $0x108] sm:$0xff]  ;;  %v470_v6 = vld [vmem:[#allocation7 + $0x110] sm:$0xff] }
  0x7a   : > { %1337 = vmatprep.subr.bf16.mxu0 %v1336_v17  ;;  %v1384_v5 = vpack.c.bf16 %v469_v4, %v468_v3  ;;  %v471_v7 = vld [vmem:[#allocation7 + $0x118] sm:$0xff]  ;;  %v472_v12 = vld [vmem:[#allocation7 + $0x120] sm:$0xff]  ;;  %v473_v14 = vld [vmem:[#allocation7 + $0x128] sm:$0xff] }
  0x7b   : > { %v279_v8 = vld [vmem:[#allocation2 + $0x8] sm:$0xff]  ;;  %v1388_v9 = vpack.c.bf16 %v471_v7, %v470_v6  ;;  %v1392_v15 = vpack.c.bf16 %v473_v14, %v472_v12  ;;  %v474_v16 = vld [vmem:[#allocation7 + $0x130] sm:$0xff]  ;;  %v476_v19 = vld [vmem:[#allocation7 + $0x140] sm:$0xff] }
  0x7c   : > { %1427 = vmatpush3.bf16.msra.mxu1 %v1424_v34  ;;  %v465_v11 = vld [vmem:[#allocation2 + $0x2] sm:$0xff]  ;;  %v480_v25 = vld [vmem:[#allocation7 + $0x160] sm:$0xff]  ;;  %v481_v26 = vld [vmem:[#allocation7 + $0x168] sm:$0xff] }
  0x7d   : > { %1339 = vmatpush3.bf16.msra.mxu0 %v1336_v17  ;;  %1429 = vmatprep.subr.bf16.mxu1 %v1428_v40  ;;  %v475_v17 = vld [vmem:[#allocation7 + $0x138] sm:$0xff]  ;;  %v478_v22 = vld [vmem:[#allocation7 + $0x150] sm:$0xff]  ;;  %v1408_v27 = vpack.c.bf16 %v481_v26, %v480_v25  ;;  %v609_v35 = vld [vmem:[#allocation9 + $0xe0] sm:$0xff] }
  0x7e   : > { %1341 = vmatprep.subr.bf16.mxu0 %v1340_v20  ;;  %v1396_v18 = vpack.c.bf16 %v475_v17, %v474_v16  ;;  %v479_v23 = vld [vmem:[#allocation7 + $0x158] sm:$0xff]  ;;  %v482_v28 = vld [vmem:[#allocation7 + $0x170] sm:$0xff]  ;;  %v610_v36 = vld [vmem:[#allocation9 + $0xe8] sm:$0xff] }
  0x7f   : > { %v1404_v24 = vpack.c.bf16 %v479_v23, %v478_v22  ;;  %v483_v29 = vld [vmem:[#allocation7 + $0x178] sm:$0xff]  ;;  %v607_v32 = vld [vmem:[#allocation9 + $0xd0] sm:$0xff]  ;;  %v578_v41 = vld [vmem:[#allocation9] sm:$0xff] }
  0x80   : > { %1431 = vmatpush3.bf16.msra.mxu1 %v1428_v40  ;;  %v1412_v30 = vpack.c.bf16 %v483_v29, %v482_v28  ;;  %v608_v33 = vld [vmem:[#allocation9 + $0xd8] sm:$0xff]  ;;  %v611_v38 = vld [vmem:[#allocation9 + $0xf0] sm:$0xff]  ;;  %v579_v42 = vld [vmem:[#allocation9 + $0x8] sm:$0xff] }
  0x81   : > { %1343 = vmatpush3.bf16.msra.mxu0 %v1340_v20  ;;  %1433 = vmatprep.subr.bf16.mxu1 %v1432_v46  ;;  %v477_v20 = vld [vmem:[#allocation7 + $0x148] sm:$0xff]  ;;  %v1436_v34 = vpack.c.bf16 %v608_v33, %v607_v32  ;;  %v612_v39 = vld [vmem:[#allocation9 + $0xf8] sm:$0xff]  ;;  %v993_v44 = vld [vmem:[%s2054_s2] ss:$0 sm:$0xff] }
  0x82   : > { %1345 = vmatprep.subr.bf16.mxu0 %v1344_v31  ;;  %v1400_v21 = vpack.c.bf16 %v477_v20, %v476_v19  ;;  %v1444_v40 = vpack.c.bf16 %v612_v39, %v611_v38  ;;  %v580_v49 = vld [vmem:[#allocation9 + $0x10] sm:$0xff]  ;;  %v581_v50 = vld [vmem:[#allocation9 + $0x18] sm:$0xff]  ;;  %v583_v55 = vld [vmem:[#allocation9 + $0x28] sm:$0xff] }
  0x83   : > { %v1452_v53 = vpack.c.bf16 %v581_v50, %v580_v49  ;;  %v585_v58 = vld [vmem:[#allocation9 + $0x38] sm:$0xff]  ;;  %v586_v61 = vld [vmem:[#allocation9 + $0x40] sm:$0xff]  ;;  %v587_v62 = vld [vmem:[#allocation9 + $0x48] sm:$0xff] }
  0x84   : > { %1435 = vmatpush3.bf16.msra.mxu1 %v1432_v46  ;;  %v588_v0 = vld [vmem:[#allocation9 + $0x50] sm:$0xff]  ;;  %v589_v1 = vld [vmem:[#allocation9 + $0x58] sm:$0xff]  ;;  %v590_v3 = vld [vmem:[#allocation9 + $0x60] sm:$0xff] }
  0x85   : > { %1347 = vmatpush3.bf16.msra.mxu0 %v1344_v31  ;;  %v466_v31 = vld [vmem:[#allocation2 + $0xa] sm:$0xff]  ;;  %1437 = vmatprep.subr.bf16.mxu1 %v1436_v34  ;;  %v591_v4 = vld [vmem:[#allocation9 + $0x68] sm:$0xff]  ;;  %v592_v6 = vld [vmem:[#allocation9 + $0x70] sm:$0xff] }
  0x86   : > { %1349 = vmatprep.subr.bf16.mxu0 %v1348_v37  ;;  %v593_v7 = vld [vmem:[#allocation9 + $0x78] sm:$0xff]  ;;  %v768_v14 = vld [vmem:[#allocation9 + $0x110] sm:$0xff]  ;;  %v771_v19 = vld [vmem:[#allocation9 + $0x128] sm:$0xff] }
  0x87   : > { %v772_v22 = vld [vmem:[#allocation9 + $0x130] sm:$0xff]  ;;  %v773_v23 = vld [vmem:[#allocation9 + $0x138] sm:$0xff]  ;;  %v774_v25 = vld [vmem:[#allocation9 + $0x140] sm:$0xff] }
  0x88   : > { %1439 = vmatpush3.bf16.msra.mxu1 %v1436_v34  ;;  %v775_v26 = vld [vmem:[#allocation9 + $0x148] sm:$0xff]  ;;  %v776_v28 = vld [vmem:[#allocation9 + $0x150] sm:$0xff]  ;;  %v777_v29 = vld [vmem:[#allocation9 + $0x158] sm:$0xff] }
  0x89   : > { %1351 = vmatpush3.bf16.msra.mxu0 %v1348_v37  ;;  %v1440_v37 = vpack.c.bf16 %v610_v36, %v609_v35  ;;  %v779_v32 = vld [vmem:[#allocation9 + $0x168] sm:$0xff]  ;;  %v780_v34 = vld [vmem:[#allocation9 + $0x170] sm:$0xff]  ;;  %v781_v35 = vld [vmem:[#allocation9 + $0x178] sm:$0xff] }
  0x8a   : > { %1353 = vmatprep.subr.bf16.mxu0 %v1352_v43  ;;  %v1508_v36 = vpack.c.bf16 %v781_v35, %v780_v34  ;;  %v994_v38 = vld [vmem:[%s2056_s4] ss:$0 sm:$0xff] }
  0x8b   : > { %1441 = vmatprep.subr.bf16.mxu1 %v1440_v37 }
  0x8c   : > { %1143 = vmatmul.mubr.f32.vlgmr.msra.gmra.mrb[0].mxu0 %v1988_v13  ;;  %1443 = vmatpush3.bf16.msra.mxu1 %v1440_v37 }
  0x8d   : > { %1355 = vmatpush3.bf16.msra.mxu0 %v1352_v43  ;;  %1177 = vmatprep.mubr.f32.mxu0 %v278_v48  ;;  %v1448_v43 = vpack.c.bf16 %v579_v42, %v578_v41 }
  0x8e   : > { %1357 = vmatprep.subr.bf16.mxu0 %v1356_v47  ;;  %1445 = vmatprep.subr.bf16.mxu1 %v1444_v40 }
  0x90   : > { %1447 = vmatpush3.bf16.msra.mxu1 %v1444_v40 }
  0x91   : > { %1359 = vmatpush3.bf16.msra.mxu0 %v1356_v47  ;;  %1449 = vmatprep.subr.bf16.mxu1 %v1448_v43 }
  0x92   : > { %1361 = vmatprep.subr.bf16.mxu0 %v1360_v51 }
  0x95   : > { %1363 = vmatpush3.bf16.msra.mxu0 %v1360_v51 }
  0x96   : > { %1365 = vmatprep.subr.bf16.mxu0 %v1364_v54 }
  0x99   : > { %1367 = vmatpush3.bf16.msra.mxu0 %v1364_v54  ;;  %v582_v54 = vld [vmem:[#allocation9 + $0x20] sm:$0xff] }
  0x9a   : > { %1369 = vmatprep.subr.bf16.mxu0 %v1368_v57  ;;  %v1456_v56 = vpack.c.bf16 %v583_v55, %v582_v54 }
  0x9d   : > { %1371 = vmatpush3.bf16.msra.mxu0 %v1368_v57  ;;  %v584_v57 = vld [vmem:[#allocation9 + $0x30] sm:$0xff] }
  0x9e   : > { %1373 = vmatprep.subr.bf16.mxu0 %v1372_v60 }
  0xa1   : > { %1375 = vmatpush3.bf16.msra.mxu0 %v1372_v60  ;;  %v1460_v60 = vpack.c.bf16 %v585_v58, %v584_v57 }
  0xa2   : > { %1377 = vmatprep.subr.bf16.mxu0 %v1376_v63 }
  0xa5   : > { %1379 = vmatpush3.bf16.msra.mxu0 %v1376_v63  ;;  %v1464_v63 = vpack.c.bf16 %v587_v62, %v586_v61 }
  0xa6   : > { %1381 = vmatprep.subr.bf16.mxu0 %v1380_v2 }
  0xa9   : > { %1383 = vmatpush3.bf16.msra.mxu0 %v1380_v2  ;;  %v1468_v2 = vpack.c.bf16 %v589_v1, %v588_v0 }
  0xaa   : > { %1385 = vmatprep.subr.bf16.mxu0 %v1384_v5 }
  0xac   : > { %1178 = vmatmul.mubr.f32.vlgmr.msra.gmra.mrb[0].mxu0 %v279_v8  ;;  %v1476_v8 = vpack.c.bf16 %v593_v7, %v592_v6 }
  0xad   : > { %1387 = vmatpush3.bf16.msra.mxu0 %v1384_v5  ;;  %1212 = vmatprep.mubr.f32.mxu0 %v465_v11  ;;  %v1472_v5 = vpack.c.bf16 %v591_v4, %v590_v3  ;;  %v767_v11 = vld [vmem:[#allocation9 + $0x108] sm:$0xff] }
  0xae   : > { %1389 = vmatprep.subr.bf16.mxu0 %v1388_v9 }
  0xb1   : > { %1391 = vmatpush3.bf16.msra.mxu0 %v1388_v9  ;;  %v766_v9 = vld [vmem:[#allocation9 + $0x100] sm:$0xff] }
  0xb2   : > { %1393 = vmatprep.subr.bf16.mxu0 %v1392_v15  ;;  %v1480_v12 = vpack.c.bf16 %v767_v11, %v766_v9 }
  0xb5   : > { %1395 = vmatpush3.bf16.msra.mxu0 %v1392_v15  ;;  %v769_v15 = vld [vmem:[#allocation9 + $0x118] sm:$0xff] }
  0xb6   : > { %1397 = vmatprep.subr.bf16.mxu0 %v1396_v18  ;;  %v1484_v16 = vpack.c.bf16 %v769_v15, %v768_v14 }
  0xb9   : > { %1399 = vmatpush3.bf16.msra.mxu0 %v1396_v18  ;;  %v770_v18 = vld [vmem:[#allocation9 + $0x120] sm:$0xff] }
  0xba   : > { %1401 = vmatprep.subr.bf16.mxu0 %v1400_v21 }
  0xbd   : > { %1403 = vmatpush3.bf16.msra.mxu0 %v1400_v21  ;;  %v1488_v21 = vpack.c.bf16 %v771_v19, %v770_v18 }
  0xbe   : > { %1405 = vmatprep.subr.bf16.mxu0 %v1404_v24 }
  0xc1   : > { %1407 = vmatpush3.bf16.msra.mxu0 %v1404_v24  ;;  %v1492_v24 = vpack.c.bf16 %v773_v23, %v772_v22 }
  0xc2   : > { %1409 = vmatprep.subr.bf16.mxu0 %v1408_v27 }
  0xc5   : > { %1411 = vmatpush3.bf16.msra.mxu0 %v1408_v27  ;;  %v1496_v27 = vpack.c.bf16 %v775_v26, %v774_v25 }
  0xc6   : > { %1413 = vmatprep.subr.bf16.mxu0 %v1412_v30 }
  0xc9   : > { %1415 = vmatpush3.bf16.msra.mxu0 %v1412_v30  ;;  %v1500_v30 = vpack.c.bf16 %v777_v29, %v776_v28 }
  0xcc   : > { %1213 = vmatmul.mubr.f32.vlgmr.msra.gmra.mrb[0].mxu0 %v466_v31  ;;  %v778_v31 = vld [vmem:[#allocation9 + $0x160] sm:$0xff] }
  0xcd   : > { %v1504_v33 = vpack.c.bf16 %v779_v32, %v778_v31 }
 0x19f   : > { %v1214_v45 = vpop.f32.mrb[0].mxu0 }
 0x1a0   : > { %v569_v46 = vadd.f32 %v1214_v45, %v993_v44  ;;  %v550_v47 = vpop.f32.mrb[1].mxu0 }
 0x1a1   : > { %v568_v48 = vadd.f32 %v993_v44, %v550_v47 }
 0x1a2   : > { %v571_v51 = vmax.f32 %v569_v46, 0.0 }
 0x1a3   : > { %v570_v52 = vmax.f32 %v568_v48, 0.0 }
 0x1a4   : > { %575 = vst [vmem:[#allocation3 + $0x9] sm:$0xff] %v571_v51 }
 0x1a5   : > { %574 = vst [vmem:[#allocation3 + $0x1] sm:$0xff] %v570_v52  ;;  %1247 = vmatprep.mubr.f32.mxu1 %v570_v52 }
 0x1a6   : > { %1248 = vmatmul.mubr.f32.vlgmr.msra.gmra.mrb[0].mxu1 %v571_v51 }
 0x1a7   : > { %1451 = vmatpush3.bf16.msra.mxu1 %v1448_v43 }
 0x1a8   : > { %1453 = vmatprep.subr.bf16.mxu1 %v1452_v53 }
 0x1ab   : > { %1455 = vmatpush3.bf16.msra.mxu1 %v1452_v53  ;;  %v764_v37 = vld [vmem:[#allocation3 + $0xa] sm:$0xff] }
 0x1ac   : > { %v576_v59 = vld [vmem:[#allocation3] sm:$0xff]  ;;  %1457 = vmatprep.subr.bf16.mxu1 %v1456_v56  ;;  %v577_v17 = vld [vmem:[#allocation3 + $0x8] sm:$0xff] }
 0x1ad   : > { %1282 = vmatprep.mubr.f32.mxu1 %v576_v59  ;;  %v763_v20 = vld [vmem:[#allocation3 + $0x2] sm:$0xff] }
 0x1af   : > { %1459 = vmatpush3.bf16.msra.mxu1 %v1456_v56 }
 0x1b0   : > { %1461 = vmatprep.subr.bf16.mxu1 %v1460_v60 }
 0x1b3   : > { %1463 = vmatpush3.bf16.msra.mxu1 %v1460_v60 }
 0x1b4   : > { %1465 = vmatprep.subr.bf16.mxu1 %v1464_v63 }
 0x1b7   : > { %1467 = vmatpush3.bf16.msra.mxu1 %v1464_v63 }
 0x1b8   : > { %1469 = vmatprep.subr.bf16.mxu1 %v1468_v2 }
 0x1bb   : > { %1471 = vmatpush3.bf16.msra.mxu1 %v1468_v2 }
 0x1bc   : > { %1473 = vmatprep.subr.bf16.mxu1 %v1472_v5 }
 0x1bf   : > { %1475 = vmatpush3.bf16.msra.mxu1 %v1472_v5 }
 0x1c0   : > { %1477 = vmatprep.subr.bf16.mxu1 %v1476_v8 }
 0x1c3   : > { %1479 = vmatpush3.bf16.msra.mxu1 %v1476_v8 }
 0x1c4   : > { %1481 = vmatprep.subr.bf16.mxu1 %v1480_v12 }
 0x1c6   : > { %1283 = vmatmul.mubr.f32.vlgmr.msra.gmra.mrb[0].mxu1 %v577_v17 }
 0x1c7   : > { %1483 = vmatpush3.bf16.msra.mxu1 %v1480_v12  ;;  %1317 = vmatprep.mubr.f32.mxu1 %v763_v20 }
 0x1c8   : > { %1485 = vmatprep.subr.bf16.mxu1 %v1484_v16 }
 0x1cb   : > { %1487 = vmatpush3.bf16.msra.mxu1 %v1484_v16 }
 0x1cc   : > { %1489 = vmatprep.subr.bf16.mxu1 %v1488_v21 }
 0x1cf   : > { %1491 = vmatpush3.bf16.msra.mxu1 %v1488_v21 }
 0x1d0   : > { %1493 = vmatprep.subr.bf16.mxu1 %v1492_v24 }
 0x1d3   : > { %1495 = vmatpush3.bf16.msra.mxu1 %v1492_v24 }
 0x1d4   : > { %1497 = vmatprep.subr.bf16.mxu1 %v1496_v27 }
 0x1d7   : > { %1499 = vmatpush3.bf16.msra.mxu1 %v1496_v27 }
 0x1d8   : > { %1501 = vmatprep.subr.bf16.mxu1 %v1500_v30 }
 0x1db   : > { %1503 = vmatpush3.bf16.msra.mxu1 %v1500_v30 }
 0x1dc   : > { %1505 = vmatprep.subr.bf16.mxu1 %v1504_v33 }
 0x1df   : > { %1507 = vmatpush3.bf16.msra.mxu1 %v1504_v33 }
 0x1e0   : > { %1509 = vmatprep.subr.bf16.mxu1 %v1508_v36 }
 0x1e3   : > { %1511 = vmatpush3.bf16.msra.mxu1 %v1508_v36 }
 0x1e6   : > { %1318 = vmatmul.mubr.f32.vlgmr.msra.gmra.mrb[0].mxu1 %v764_v37 }
 0x2b9   : > { %v1319_v39 = vpop.f32.mrb[0].mxu1 }
 0x2ba   : > { %v867_v40 = vadd.f32 %v1319_v39, %v994_v38  ;;  %v848_v41 = vpop.f32.mrb[1].mxu1 }
 0x2bb   : > { %v866_v42 = vadd.f32 %v994_v38, %v848_v41 }
 0x2bc   : > { %v869_v43 = vmul.f32 0.1, %v867_v40 }
 0x2bd   : > { %v868_v44 = vmul.f32 0.1, %v866_v42 }
 0x2be   : > { %v871_v45 = vadd.f32 %v869_v43, %v1988_v13 }
 0x2bf   : > { %v870_v46 = vadd.f32 %v868_v44, %v1984_v10 }
 0x2c0   : > { %873 = vst [vmem:[%s271_s10 + $0x8] sm:$0xff] %v871_v45 }
 0x2c1   : > { %872 = vst [vmem:[%s271_s10] sm:$0xff] %v870_v46 }
 0x2c2   : > { %1691 = shalt.err (!%p1688_p1)
}
 0x2c3   : > { %s1692_s12 = scalar_lea.hbm %s2007_s11, 256  ;;  %s1696_s15 = scalar_lea.hbm %s2057_s5, 512 }
 0x2c4   : > { %p1693_p13 = scmp.ne.s32.totalorder %s2007_s11, %s1692_s12  ;;  %p1697_p4 = scmp.lt.u32.totalorder %s2007_s11, %s2057_s5 }
 0x2c5   : > { %p1698_p5 = scmp.lt.u32.totalorder %s1696_s15, %s1692_s12  ;;  %p1700_p11 = scmp.lt.u32.totalorder %s1692_s12, %s2007_s11 }
 0x2c6   : > { %p1694_p6 = pnand %p1693_p13, %p2071_p0 }
 0x2c7   : > { %p1699_p8 = por %p1698_p5, %p1697_p4 }
 0x2c8   : > { %p1695_p10 = pneg %p1694_p6 }
 0x2c9   : > { %p1701_p2 = por %p1700_p11, %p1699_p8 }
 0x2cb   : > { %p1702_p3 = pnand %p1701_p2, %p1695_p10 }
 0x2cd   : > { %1705 = shalt.err (!%p1702_p3)
}
 0x2ce   : > { %s1757_s13 = smov 128   ;;  %s1758_s9 = smov 8  }
 0x2cf   : > { %1530 = dma.vmem_to_hbm [thread:$0]  (%p2071_p0), %s2001_s28, 256, %s2007_s11, %s875_s17, %s1757_s13, %s1757_s13, %s1758_s9  }
 0x2d0 PF: > { %s903_s30 = sand.u32 1, %s1736_s18   ;;  %p2072_p7 = scmp.ne.s32.totalorder %s2062_s25, 0 }
 0x2d1   : > { %p2073_p9 = scmp.ge.s32.totalorder %s1748_s21, 2  ;;  %s904_s22 = scalar_lea.sflag [#allocation6], %s903_s30 }
 0x2d3   : > { %p1544_p12 = pnand %p2073_p9, %p2072_p7 }
 0x2d5   : > { %1731 = dma.done.wait (!%p1544_p12), %s904_s22, 256  }
 0x2d6   : > { %1733 = vsyncadd (!%p1544_p12), %s904_s22, 4294967040  ;;  %p19_p1 = scmp.ge.s32.totalorder %s1905_s29, 4   ;;  %s2074_s18 = smov %s1740_s19 }
 0x2d7   : > { %s2075_s19 = smov %s1744_s20  ;;  %s2076_s20 = smov %s1921_s27 }
 0x2d8   : > { %s2077_s21 = smov %s1905_s29  ;;  %21 = sbr.rel (!%p19_p1) target bundleno = 6 (0x6), region = 97 }
 0x2df   :  { %909 = vsyncpa [#allocation5], 1 }
 0x2e0   :  { %911 = vsyncpa [#allocation5 + $0x1], 1 }
 0x2e1   :  { %912 = vsyncpa [#allocation8], 1 }
 0x2e2   :  { %913 = vsyncpa [#allocation6], 1 }
 0x2e3   :  { %915 = vsyncpa [#allocation6 + $0x1], 1 }

</bundles_post_ra>
